<compile_context>
chip_gen: v7x
topology: tpu7x:2x2x1
jax: 0.10.0
libtpu: 0.0.40
codegen_flags: <defaults>
</compile_context>

<pallas_src>
import math

import jax
import jax.numpy as jnp
from jax.experimental import pallas as pl
from jax.experimental.pallas import tpu as pltpu

TILE_N = 1024   # default point tile (multiple of 8; a few hundred KB of VMEM)


def _decoder_kernel(feats_ref, offs_ref, w1f_ref, woff_ref, bf_ref,
                    w2_ref, b2_ref, out_ref):
    # fused decoder[0]: feats(bf16) @ w1_feat(bf16) + offs @ (w_off @ w1_off) + b
    h = (jnp.dot(feats_ref[...], w1f_ref[...],
                 preferred_element_type=jnp.float32)
         + jnp.dot(offs_ref[...], woff_ref[...],
                   preferred_element_type=jnp.float32)
         + bf_ref[...])
    # decoder[1]: nn.GELU() default == exact erf GELU (f32, PyTorch parity)
    h = 0.5 * h * (1.0 + jax.lax.erf(h * 0.7071067811865476))
    # decoder[2]: Linear(32, 3); bf16 inputs, f32 accumulation, narrow f32 store
    out_ref[...] = (jnp.dot(h.astype(jnp.bfloat16), w2_ref[...],
                            preferred_element_type=jnp.float32)
                    + b2_ref[...]).astype(out_ref.dtype)


def _fuse_params(params, pseudoimage_channels):
    """Fold offset_encoder into decoder[0]; keep weights in MXU-friendly dtypes."""
    w_off, b_off, w1, b1, w2, b2 = params
    c2 = pseudoimage_channels * 2
    w1_feat = w1[:c2, :]                    # (2C, 32)
    w1_off = w1[c2:, :]                     # (128, 32)
    w_off_fused = w_off @ w1_off            # (3, 32)  exact fold
    b_fused = b_off @ w1_off + b1           # (1, 32)  exact fold
    return (w1_feat.astype(jnp.bfloat16),
            w_off_fused.astype(jnp.float32),
            b_fused.astype(jnp.float32),
            w2.astype(jnp.bfloat16),
            b2.astype(jnp.float32))


def _next_pow2(x):
    return 1 if x <= 1 else 1 << (x - 1).bit_length()


def _plan_tiles(n, tile_n=TILE_N):
    """Pick (tile, num_tiles, n_pad).

    tile is a multiple of 8; the grid keeps >= 2 tiles so v7x can shard across
    both TensorCores; num_tiles is bucketed to a power of two so varying point
    counts reuse a small set of compiled shapes."""
    half = max(8, ((n + 1) // 2 + 7) // 8 * 8)   # ~n/2 rounded up to 8
    tile = max(8, (min(tile_n, half) // 8) * 8)
    num_tiles = max(2, _next_pow2(-(-n // tile)))
    return tile, num_tiles, tile * num_tiles


def linear_decoder_batched(feats, offs, fused_params, tile_n, num_tiles):
    """feats: (n_pad, 2C) bf16, offs: (n_pad, 3) f32 -> flow (n_pad, 3) f32."""
    w1f, woff, bf, w2, b2 = fused_params
    n_pad, c2 = feats.shape
    assert n_pad == tile_n * num_tiles

    return pl.pallas_call(
        _decoder_kernel,
        out_shape=jax.ShapeDtypeStruct((n_pad, 3), jnp.float32),
        grid_spec=pltpu.PrefetchScalarGridSpec(
            num_scalar_prefetch=0,
            grid=(num_tiles,),
            in_specs=[
                pl.BlockSpec((tile_n, c2), lambda i: (i, 0)),   # feats tile
                pl.BlockSpec((tile_n, 3), lambda i: (i, 0)),    # offsets tile
                pl.BlockSpec(w1f.shape, lambda i: (0, 0)),      # resident weights
                pl.BlockSpec(woff.shape, lambda i: (0, 0)),
                pl.BlockSpec(bf.shape, lambda i: (0, 0)),
                pl.BlockSpec(w2.shape, lambda i: (0, 0)),
                pl.BlockSpec(b2.shape, lambda i: (0, 0)),
            ],
            out_specs=pl.BlockSpec((tile_n, 3), lambda i: (i, 0)),
        ),
        compiler_params=pltpu.CompilerParams(
            dimension_semantics=("parallel",)),
    )(feats, offs, w1f, woff, bf, w2, b2)


def linear_decoder_forward(before_pseudoimages, after_pseudoimages,
                           voxelizer_infos, params, tile_n=TILE_N):
    """Mirrors LinearDecoder.forward: returns a list of (N_i, 3) f32 flows."""
    B, C, H, W = before_pseudoimages.shape
    fused = _fuse_params(params, C)

    # Channels-last bf16 pseudoimages: the per-point gather below then produces
    # feats directly in bf16 (cast fuses into the gather; no standalone cast).
    before_flat = jnp.transpose(before_pseudoimages, (0, 2, 3, 1)) \
                     .reshape(B * H * W, C).astype(jnp.bfloat16)
    after_flat = jnp.transpose(after_pseudoimages, (0, 2, 3, 1)) \
                    .reshape(B * H * W, C).astype(jnp.bfloat16)

    idx_list, offs_list, sizes = [], [], []
    for b, info in enumerate(voxelizer_infos):
        coords = info["voxel_coords"].astype(jnp.int32)
        flat_idx = b * (H * W) + coords[:, 1] * W + coords[:, 2]
        idx_list.append(flat_idx)
        offs_list.append(info["point_offsets"].astype(jnp.float32))
        sizes.append(coords.shape[0])

    idx = jnp.concatenate(idx_list, axis=0)
    offs = jnp.concatenate(offs_list, axis=0)
    n = idx.shape[0]

    tile, num_tiles, n_pad = _plan_tiles(n, tile_n)
    if n_pad != n:
        # Only the tiny (n,) index and (n,3) offset arrays get padded; feats are
        # gathered straight into the padded size (no full-feats jnp.pad copy).
        idx = jnp.pad(idx, (0, n_pad - n))
        offs = jnp.pad(offs, ((0, n_pad - n), (0, 0)))

    # TODO(synk): fuse this gather into the kernel via scalar-prefetched indices
    # + in-kernel DMA row gather so feats never materializes in HBM.
    before_vec = jnp.take(before_flat, idx, axis=0)            # (n_pad, C) bf16
    after_vec = jnp.take(after_flat, idx, axis=0)              # (n_pad, C) bf16
    feats = jnp.concatenate([before_vec, after_vec], axis=1)   # (n_pad, 2C) bf16

    flow = linear_decoder_batched(feats, offs, fused, tile, num_tiles)

    flow_results, start = [], 0
    for n_b in sizes:
        flow_results.append(flow[start:start + n_b])
        start += n_b
    return flow_results


def init_params(key, pseudoimage_channels=64):
    """Deterministic PyTorch-style Linear init (uniform +/- 1/sqrt(fan_in)).

    Weights are stored as (in_features, out_features)."""
    def linear(k, fan_in, fan_out):
        kw, kb = jax.random.split(k)
        bound = 1.0 / math.sqrt(fan_in)
        w = jax.random.uniform(kw, (fan_in, fan_out), jnp.float32, -bound, bound)
        b = jax.random.uniform(kb, (1, fan_out), jnp.float32, -bound, bound)
        return w, b

    k1, k2, k3 = jax.random.split(key, 3)
    w_off, b_off = linear(k1, 3, 128)                          # offset_encoder
    w1, b1 = linear(k2, pseudoimage_channels * 4, 32)          # decoder[0]
    w2, b2 = linear(k3, 32, 3)                                 # decoder[2]
    return (w_off, b_off, w1, b1, w2, b2)


def _reference_forward(before_pseudoimages, after_pseudoimages,
                       voxelizer_infos, params):
    """Pure-JAX f32 reference of LinearDecoder.forward (correctness check)."""
    w_off, b_off, w1, b1, w2, b2 = params
    outs = []
    for b in range(before_pseudoimages.shape[0]):
        info = voxelizer_infos[b]
        coords = info["voxel_coords"].astype(jnp.int32)
        vy, vx = coords[:, 1], coords[:, 2]
        before_vec = before_pseudoimages[b][:, vy, vx].T
        after_vec = after_pseudoimages[b][:, vy, vx].T
        feats = jnp.concatenate([before_vec, after_vec], axis=1)
        off_feat = info["point_offsets"] @ w_off + b_off
        x = jnp.concatenate([feats, off_feat], axis=1)
        h = x @ w1 + b1
        h = jax.nn.gelu(h, approximate=False)
        outs.append(h @ w2 + b2)
    return outs


if __name__ == "__main__":
    key = jax.random.PRNGKey(0)
    kp, kb, ka, ko, kc = jax.random.split(key, 5)

    B, C, H, W, N = 2, 64, 16, 16, 100   # C=64 so 2C + 128 == 4C
    demo_tile = 64                       # small tile -> exercises grid + padding

    params = init_params(kp, pseudoimage_channels=C)
    before_imgs = jax.random.normal(kb, (B, C, H, W), jnp.float32)
    after_imgs = jax.random.normal(ka, (B, C, H, W), jnp.float32)

    voxelizer_infos = []
    ko_keys = jax.random.split(ko, B)
    kc_keys = jax.random.split(kc, B)
    for b in range(B):
        point_offsets = jax.random.normal(ko_keys[b], (N, 3), jnp.float32)
        vy = jax.random.randint(kc_keys[b], (N,), 0, H)
        vx = jax.random.randint(jax.random.fold_in(kc_keys[b], 1), (N,), 0, W)
        vz = jnp.zeros((N,), jnp.int32)
        voxel_coords = jnp.stack([vz, vy, vx], axis=1)
        voxelizer_infos.append(
            {"point_offsets": point_offsets, "voxel_coords": voxel_coords})

    flows = linear_decoder_forward(before_imgs, after_imgs,
                                   voxelizer_infos, params, tile_n=demo_tile)
    flows = [jax.block_until_ready(f) for f in flows]

    refs = _reference_forward(before_imgs, after_imgs, voxelizer_infos, params)
    for f, r in zip(flows, refs):
        assert f.shape == (N, 3) and f.dtype == jnp.float32
        # bf16 feats/w1/w2 inputs (f32 accumulation) loosen tolerance slightly.
        assert jnp.allclose(f, r, atol=3e-2, rtol=3e-2), \
            float(jnp.max(jnp.abs(f - r)))

    print("KERNEL_OK")
</pallas_src>

<mosaic_0001>
module attributes {stable_mosaic.version = 11 : i64} {
  func.func @_decoder_kernel(%arg0: i32, %arg1: memref<64x128xbf16, #tpu.memory_space<vmem>>, %arg2: memref<64x3xf32, #tpu.memory_space<vmem>>, %arg3: memref<128x32xbf16, #tpu.memory_space<vmem>>, %arg4: memref<3x32xf32, #tpu.memory_space<vmem>>, %arg5: memref<1x32xf32, #tpu.memory_space<vmem>>, %arg6: memref<32x3xbf16, #tpu.memory_space<vmem>>, %arg7: memref<1x3xf32, #tpu.memory_space<vmem>>, %arg8: memref<64x3xf32, #tpu.memory_space<vmem>>) attributes {dimension_semantics = [#tpu.dimension_semantics<parallel>], iteration_bounds = array<i64: 4>, scalar_prefetch = 0 : i64, scratch_operands = 0 : i64, tpu.core_type = #tpu.core_type<tc>, window_params = [{transform_indices = @transform_0, window_bounds = array<i64: 64, 128>}, {transform_indices = @transform_1, window_bounds = array<i64: 64, 3>}, {pipeline_mode = #tpu.pipeline_mode<synchronous>, transform_indices = @transform_2, window_bounds = array<i64: 128, 32>}, {pipeline_mode = #tpu.pipeline_mode<synchronous>, transform_indices = @transform_3, window_bounds = array<i64: 3, 32>}, {pipeline_mode = #tpu.pipeline_mode<synchronous>, transform_indices = @transform_4, window_bounds = array<i64: 1, 32>}, {pipeline_mode = #tpu.pipeline_mode<synchronous>, transform_indices = @transform_5, window_bounds = array<i64: 32, 3>}, {pipeline_mode = #tpu.pipeline_mode<synchronous>, transform_indices = @transform_6, window_bounds = array<i64: 1, 3>}, {transform_indices = @transform_7, window_bounds = array<i64: 64, 3>}]} {
    %c0 = arith.constant 0 : index
    %c0_0 = arith.constant 0 : index
    %0 = vector.load %arg1[%c0, %c0_0] : memref<64x128xbf16, #tpu.memory_space<vmem>>, vector<64x128xbf16>
    %c0_1 = arith.constant 0 : index
    %c0_2 = arith.constant 0 : index
    %1 = vector.load %arg3[%c0_1, %c0_2] : memref<128x32xbf16, #tpu.memory_space<vmem>>, vector<128x32xbf16>
    %cst = arith.constant dense<0.000000e+00> : vector<64x32xf32>
    %2 = tpu.matmul %0, %1, %cst {dimension_numbers = #tpu.dot_dimension_numbers<[1], [0], [0], [1], [0, 0, 1, 1], [], []>} : vector<64x128xbf16>, vector<128x32xbf16>, vector<64x32xf32> -> vector<64x32xf32>
    %c0_3 = arith.constant 0 : index
    %c0_4 = arith.constant 0 : index
    %3 = vector.load %arg2[%c0_3, %c0_4] : memref<64x3xf32, #tpu.memory_space<vmem>>, vector<64x3xf32>
    %c0_5 = arith.constant 0 : index
    %c0_6 = arith.constant 0 : index
    %4 = vector.load %arg4[%c0_5, %c0_6] : memref<3x32xf32, #tpu.memory_space<vmem>>, vector<3x32xf32>
    %cst_7 = arith.constant dense<0.000000e+00> : vector<64x32xf32>
    %5 = tpu.matmul %3, %4, %cst_7 {dimension_numbers = #tpu.dot_dimension_numbers<[1], [0], [0], [1], [0, 0, 1, 1], [], []>} : vector<64x3xf32>, vector<3x32xf32>, vector<64x32xf32> -> vector<64x32xf32>
    %6 = arith.addf %2, %5 : vector<64x32xf32>
    %c0_8 = arith.constant 0 : index
    %c0_9 = arith.constant 0 : index
    %7 = vector.load %arg5[%c0_8, %c0_9] : memref<1x32xf32, #tpu.memory_space<vmem>>, vector<1x32xf32>
    %8 = vector.broadcast %7 : vector<1x32xf32> to vector<64x32xf32>
    %9 = arith.addf %6, %8 : vector<64x32xf32>
    %cst_10 = arith.constant 5.000000e-01 : f32
    %10 = vector.broadcast %cst_10 : f32 to vector<64x32xf32>
    %11 = arith.mulf %10, %9 : vector<64x32xf32>
    %cst_11 = arith.constant 0.707106769 : f32
    %12 = vector.broadcast %cst_11 : f32 to vector<64x32xf32>
    %13 = arith.mulf %9, %12 : vector<64x32xf32>
    %14 = math.erf %13 : vector<64x32xf32>
    %cst_12 = arith.constant 1.000000e+00 : f32
    %15 = vector.broadcast %cst_12 : f32 to vector<64x32xf32>
    %16 = arith.addf %15, %14 : vector<64x32xf32>
    %17 = arith.mulf %11, %16 : vector<64x32xf32>
    %18 = arith.truncf %17 : vector<64x32xf32> to vector<64x32xbf16>
    %c0_13 = arith.constant 0 : index
    %c0_14 = arith.constant 0 : index
    %19 = vector.load %arg6[%c0_13, %c0_14] : memref<32x3xbf16, #tpu.memory_space<vmem>>, vector<32x3xbf16>
    %cst_15 = arith.constant dense<0.000000e+00> : vector<64x3xf32>
    %20 = tpu.matmul %18, %19, %cst_15 {dimension_numbers = #tpu.dot_dimension_numbers<[1], [0], [0], [1], [0, 0, 1, 1], [], []>} : vector<64x32xbf16>, vector<32x3xbf16>, vector<64x3xf32> -> vector<64x3xf32>
    %c0_16 = arith.constant 0 : index
    %c0_17 = arith.constant 0 : index
    %21 = vector.load %arg7[%c0_16, %c0_17] : memref<1x3xf32, #tpu.memory_space<vmem>>, vector<1x3xf32>
    %22 = vector.broadcast %21 : vector<1x3xf32> to vector<64x3xf32>
    %23 = arith.addf %20, %22 : vector<64x3xf32>
    %c0_18 = arith.constant 0 : index
    %c0_19 = arith.constant 0 : index
    %24 = vector.load %arg8[%c0_18, %c0_19] : memref<64x3xf32, #tpu.memory_space<vmem>>, vector<64x3xf32>
    tpu.vector_store %arg8[%c0_18, %c0_19], %23 {strides = array<i32>} : memref<64x3xf32, #tpu.memory_space<vmem>>, vector<64x3xf32>,
    return
  }
  func.func @transform_0(%arg0: i32) -> (i32, i32) {
    %c0_i32 = arith.constant 0 : i32
    %c0_i32_0 = arith.constant 0 : i32
    return %arg0, %c0_i32 : i32, i32
  }
  func.func @transform_1(%arg0: i32) -> (i32, i32) {
    %c0_i32 = arith.constant 0 : i32
    %c0_i32_0 = arith.constant 0 : i32
    return %arg0, %c0_i32 : i32, i32
  }
  func.func @transform_2(%arg0: i32) -> (i32, i32) {
    %c0_i32 = arith.constant 0 : i32
    %c0_i32_0 = arith.constant 0 : i32
    %c0_i32_1 = arith.constant 0 : i32
    return %c0_i32, %c0_i32_0 : i32, i32
  }
  func.func @transform_3(%arg0: i32) -> (i32, i32) {
    %c0_i32 = arith.constant 0 : i32
    %c0_i32_0 = arith.constant 0 : i32
    %c0_i32_1 = arith.constant 0 : i32
    return %c0_i32, %c0_i32_0 : i32, i32
  }
  func.func @transform_4(%arg0: i32) -> (i32, i32) {
    %c0_i32 = arith.constant 0 : i32
    %c0_i32_0 = arith.constant 0 : i32
    %c0_i32_1 = arith.constant 0 : i32
    return %c0_i32, %c0_i32_0 : i32, i32
  }
  func.func @transform_5(%arg0: i32) -> (i32, i32) {
    %c0_i32 = arith.constant 0 : i32
    %c0_i32_0 = arith.constant 0 : i32
    %c0_i32_1 = arith.constant 0 : i32
    return %c0_i32, %c0_i32_0 : i32, i32
  }
  func.func @transform_6(%arg0: i32) -> (i32, i32) {
    %c0_i32 = arith.constant 0 : i32
    %c0_i32_0 = arith.constant 0 : i32
    %c0_i32_1 = arith.constant 0 : i32
    return %c0_i32, %c0_i32_0 : i32, i32
  }
  func.func @transform_7(%arg0: i32) -> (i32, i32) {
    %c0_i32 = arith.constant 0 : i32
    %c0_i32_0 = arith.constant 0 : i32
    return %arg0, %c0_i32 : i32, i32
  }
}

</mosaic_0001>

<bundles_post_ra>
// kernel: tpu_custom_call.1
= control target key start
LH: loop header
LB: loop body
LE: loop exit
PB: predicated region body
PF: predicated region fallthrough
CT: control target
= control target key end

     0   :  { %s1050_s24 = smov 0   ;;  %s1143_s0 = inlined_call_operand.vmem [shape: bf16[256,128], index: 0, kind: input, shape index: {}]   ;;  %s1144_s1 = inlined_call_operand.vmem [shape: f32[256,3], index: 1, kind: input, shape index: {}]   ;;  %s1145_s2 = inlined_call_operand.vmem [shape: bf16[128,32], index: 2, kind: input, shape index: {}]   ;;  %s1146_s3 = inlined_call_operand.vmem [shape: f32[3,32], index: 3, kind: input, shape index: {}]   ;;  %s1147_s4 = inlined_call_operand.vmem [shape: f32[1,32], index: 4, kind: input, shape index: {}]   ;;  %s1148_s5 = inlined_call_operand.vmem [shape: bf16[32,3], index: 5, kind: input, shape index: {}]   ;;  %s1149_s6 = inlined_call_operand.vmem [shape: f32[1,3], index: 6, kind: input, shape index: {}]   ;;  %s1150_s7 = inlined_call_operand.vmem [shape: f32[256,3], index: 7, kind: output, shape index: {}]  }
   0x1 LB: > { %s845_s25 = sadd.s32 4294967295, %s1008_s24   ;;  %p849_p0 = scmp.ge.s32.totalorder %s1008_s24, 1  ;;  %s1008_s24 = sphi %s1050_s24, %s17_s24  }
   0x2   : > { %p249_p1 = scmp.lt.s32.totalorder %s1008_s24, 5 }
   0x4   : > { %p250_p2 = pnand %p849_p0, %p249_p1 }
   0x5   : > { %v972_v0 = vld [vmem:[%s1145_s2] sm:$0xff] (!%p250_p2)   ;;  %v973_v1 = vld [vmem:[%s1145_s2 + $0x8] sm:$0xff] (!%p250_p2)   ;;  %s850_s30 = sshll.u32 (!%p250_p2), %s845_s25, 3  ;;  %v974_v2 = vld [vmem:[%s1145_s2 + $0x10] sm:$0xff] (!%p250_p2)   ;;  %vm363_vm0 = vcmask (!%p250_p2), 1042432   ;;  %vm338_vm1 = vcmask (!%p250_p2), 23552  }
   0x6   : > { %253 = sbr.rel (%p250_p2) target bundleno = 503 (0x1f7), region = 48  ;;  %928 = vmatprep.subr.bf16.mxu1 (!%p250_p2), %v972_v0  ;;  %p287_p3 = scmp.lt.s32.totalorder (!%p250_p2), %s850_s30, 31  ;;  %v337_v3 = vld [vmem:[%s1146_s3] sm:$0x7] (!%p250_p2)  ;;  %v975_v4 = vld [vmem:[%s1145_s2 + $0x18] sm:$0xff] (!%p250_p2)   ;;  %v977_v13 = vld [vmem:[%s1145_s2 + $0x28] sm:$0xff] (!%p250_p2)  }
   0x7   : > { %929 = vmatpush3.bf16.msra.mxu1 (!%p250_p2), %v972_v0  ;;  %914 = vmatprep.subr.msk.mxu0 (!%p250_p2), %vm363_vm0, %v337_v3  ;;  %v976_v10 = vld [vmem:[%s1145_s2 + $0x20] sm:$0xff] (!%p250_p2)   ;;  %v978_v16 = vld [vmem:[%s1145_s2 + $0x30] sm:$0xff] (!%p250_p2)   ;;  %v979_v17 = vld [vmem:[%s1145_s2 + $0x38] sm:$0xff] (!%p250_p2)   ;;  %vm691_vm2 = vcmask (!%p250_p2), 261120  }
   0x8   : > { %930 = vmatprep.subr.bf16.mxu1 (!%p250_p2), %v973_v1  ;;  %915 = vmatpush3.msk.msra.mxu0 (!%p250_p2), %vm363_vm0, %v337_v3  ;;  %v984_v21 = vld [vmem:[%s1148_s5] sm:$0xff] (!%p250_p2)   ;;  %v985_v22 = vld [vmem:[%s1148_s5 + $0x8] sm:$0xff] (!%p250_p2)  }
   0x9   : > { %952 = vmatprep.subr.bf16.mxu0 (!%p250_p2), %v984_v21  ;;  %v877_v32 = vld [vmem:[%s1147_s4] ss:$0 sm:$0xff] (!%p250_p2) }
   0xb   : > { %931 = vmatpush3.bf16.msra.mxu1 (!%p250_p2), %v973_v1 }
   0xc   : > { %932 = vmatprep.subr.bf16.mxu1 (!%p250_p2), %v974_v2 }
   0xd   : > { %s1152_s30 = smov (!%p287_p3, %s850_s30), 31 }
   0xe   : > { %s853_s10 = sshll.u32 %s1152_s30, 3  ;;  %s851_s18 = sshll.u32 %s1152_s30, 2 }
   0xf   : > { %s296_s15 = scalar_lea.vmem %s1144_s1, %s853_s10  ;;  %s1086_s21 = scalar_lea.vmem %s1143_s0, %s851_s18  ;;  %933 = vmatpush3.bf16.msra.mxu1 %v974_v2 }
  0x10   : > { %v329_v5 = vld [vmem:[%s296_s15] sm:$0xff]  ;;  %v330_v6 = vld [vmem:[%s296_s15 + $0x8] sm:$0xff]  ;;  %v331_v7 = vld [vmem:[%s296_s15 + $0x10] sm:$0xff]  ;;  %934 = vmatprep.subr.bf16.mxu1 %v975_v4  ;;  %s302_s20 = scalar_lea.vmem %s1150_s7, %s853_s10 }
  0x11   : > { %916 = vmatprep.mubr.msk.f32.mxu0 %vm338_vm1, %v329_v5  ;;  %v980_v8 = vld [vmem:[%s1086_s21] sm:$0xff]   ;;  %v332_v9 = vld [vmem:[%s296_s15 + $0x18] sm:$0xff]  ;;  %v334_v12 = vld [vmem:[%s296_s15 + $0x28] sm:$0xff] }
  0x12   : > { %917 = vmatmul.mubr.msk.f32.vlgmr.msra.gmra.mrb[0].mxu0 %vm338_vm1, %v330_v6  ;;  %944 = vmatprep.mubr.bf16.mxu1 %v980_v8  ;;  %v333_v11 = vld [vmem:[%s296_s15 + $0x20] sm:$0xff]  ;;  %v335_v14 = vld [vmem:[%s296_s15 + $0x30] sm:$0xff]  ;;  %v336_v15 = vld [vmem:[%s296_s15 + $0x38] sm:$0xff] }
  0x13   : > { %919 = vmatprep.mubr.msk.f32.mxu0 %vm338_vm1, %v331_v7  ;;  %935 = vmatpush3.bf16.msra.mxu1 %v975_v4  ;;  %v981_v18 = vld [vmem:[%s1086_s21 + $0x8] sm:$0xff]   ;;  %v982_v19 = vld [vmem:[%s1086_s21 + $0x10] sm:$0xff]   ;;  %v983_v20 = vld [vmem:[%s1086_s21 + $0x18] sm:$0xff]  }
  0x14   : > { %936 = vmatprep.subr.bf16.mxu1 %v976_v10  ;;  %953 = vmatpush3.bf16.msra.mxu0 %v984_v21 }
  0x15   : > { %954 = vmatprep.subr.bf16.mxu0 %v985_v22 }
  0x16   : > { %920 = vmatmul.mubr.msk.f32.gmra.mrb[2].mxu0 %vm338_vm1, %v332_v9 }
  0x17   : > { %922 = vmatprep.mubr.msk.f32.mxu0 %vm338_vm1, %v333_v11  ;;  %937 = vmatpush3.bf16.msra.mxu1 %v976_v10 }
  0x18   : > { %938 = vmatprep.subr.bf16.mxu1 %v977_v13  ;;  %955 = vmatpush3.bf16.msra.mxu0 %v985_v22 }
  0x1a   : > { %923 = vmatmul.mubr.msk.f32.gmra.mrb[4].mxu0 %vm338_vm1, %v334_v12 }
  0x1b   : > { %925 = vmatprep.mubr.msk.f32.mxu0 %vm338_vm1, %v335_v14  ;;  %939 = vmatpush3.bf16.msra.mxu1 %v977_v13 }
  0x1c   : > { %940 = vmatprep.subr.bf16.mxu1 %v978_v16 }
  0x1e   : > { %926 = vmatmul.mubr.msk.f32.gmra.mrb[6].mxu0 %vm338_vm1, %v336_v15 }
  0x1f   : > { %941 = vmatpush3.bf16.msra.mxu1 %v978_v16 }
  0x20   : > { %942 = vmatprep.subr.bf16.mxu1 %v979_v17 }
  0x23   : > { %943 = vmatpush3.bf16.msra.mxu1 %v979_v17 }
  0x26   : > { %945 = vmatmul.mubr.bf16.vlgmr.msra.gmra.mrb[0].mxu1 %v981_v18 }
  0x27   : > { %948 = vmatprep.mubr.bf16.mxu1 %v982_v19 }
  0x2e   : > { %949 = vmatmul.mubr.bf16.gmra.mrb[4].mxu1 %v983_v20 }
  0xe5   : > { %v918_v23 = vpop.f32.mrb[0].mxu0 }
  0xe6   : > { %v433_v24 = vpop.f32.mrb[1].mxu0 }
  0xe9   : > { %v921_v25 = vpop.f32.mrb[2].mxu0 }
  0xea   : > { %v443_v26 = vpop.f32.mrb[3].mxu0 }
  0xed   : > { %v924_v27 = vpop.f32.mrb[4].mxu0 }
  0xee   : > { %v453_v28 = vpop.f32.mrb[5].mxu0 }
  0xf1   : > { %v927_v29 = vpop.f32.mrb[6].mxu0 }
  0xf2   : > { %v463_v30 = vpop.f32.mrb[7].mxu0 }
  0xf9   : > { %v946_v31 = vpop.f32.mrb[0].mxu1 }
  0xfa   : > { %v587_v33 = vadd.f32 %v946_v31, %v443_v26  ;;  %v578_v34 = vpop.f32.mrb[1].mxu1 }
  0xfb   : > { %v579_v35 = vadd.f32 %v578_v34, %v433_v24  ;;  %v947_v36 = vpop.f32.mrb[2].mxu1 }
  0xfc   : > { %v618_v37 = vadd.f32 %v877_v32, %v587_v33  ;;  %v590_v38 = vadd.f32 %v947_v36, %v921_v25  ;;  %v581_v39 = vpop.f32.mrb[3].mxu1  ;;  %v878_v36 = vld [vmem:[%s1149_s6] ss:$0 sm:$0xff] }
  0xfd   : > { %v616_v40 = vadd.f32 %v877_v32, %v579_v35  ;;  %v582_v41 = vadd.f32 %v918_v23, %v581_v39 }
  0xfe   : > { %v634_v42 = vmul.f32 0.70710677, %v618_v37  ;;  %v619_v43 = vadd.f32 %v877_v32, %v590_v38  ;;  %v626_v6 = vmul.f32 0.5, %v618_v37 }
  0xff   : > { %v632_v44 = vmul.f32 0.70710677, %v616_v40  ;;  %v617_v45 = vadd.f32 %v877_v32, %v582_v41  ;;  %v624_v9 = vmul.f32 0.5, %v616_v40 }
 0x100   : > { %986 = verf.f32 %v634_v42  ;;  %v635_v46 = vmul.f32 0.70710677, %v619_v43  ;;  %v627_v7 = vmul.f32 0.5, %v619_v43 }
 0x101   : > { %988 = verf.f32 %v632_v44  ;;  %v633_v47 = vmul.f32 0.70710677, %v617_v45  ;;  %v950_v48 = vpop.f32.mrb[4].mxu1  ;;  %v625_v10 = vmul.f32 0.5, %v617_v45 }
 0x102   : > { %990 = verf.f32 %v635_v46  ;;  %v603_v49 = vadd.f32 %v950_v48, %v463_v30  ;;  %v594_v50 = vpop.f32.mrb[5].mxu1 }
 0x103   : > { %992 = verf.f32 %v633_v47  ;;  %v595_v51 = vadd.f32 %v594_v50, %v453_v28  ;;  %v951_v52 = vpop.f32.mrb[6].mxu1 }
 0x104   : > { %v622_v53 = vadd.f32 %v877_v32, %v603_v49  ;;  %v606_v54 = vadd.f32 %v951_v52, %v927_v29  ;;  %v597_v55 = vpop.f32.mrb[7].mxu1 }
 0x105   : > { %v620_v56 = vadd.f32 %v877_v32, %v595_v51  ;;  %v598_v57 = vadd.f32 %v924_v27, %v597_v55 }
 0x106   : > { %v638_v58 = vmul.f32 0.70710677, %v622_v53  ;;  %v623_v59 = vadd.f32 %v877_v32, %v606_v54  ;;  %v630_v24 = vmul.f32 0.5, %v622_v53 }
 0x107   : > { %v636_v60 = vmul.f32 0.70710677, %v620_v56  ;;  %v621_v61 = vadd.f32 %v877_v32, %v598_v57  ;;  %v628_v27 = vmul.f32 0.5, %v620_v56 }
 0x108   : > { %994 = verf.f32 %v638_v58  ;;  %v639_v62 = vmul.f32 0.70710677, %v623_v59  ;;  %v631_v25 = vmul.f32 0.5, %v623_v59 }
 0x109   : > { %996 = verf.f32 %v636_v60  ;;  %v637_v63 = vmul.f32 0.70710677, %v621_v61  ;;  %v629_v28 = vmul.f32 0.5, %v621_v61 }
 0x10a   : > { %v987_v0 = vpop.eup %986  ;;  %998 = verf.f32 %v639_v62 }
 0x10b   : > { %v989_v1 = vpop.eup %988  ;;  %v650_v2 = vadd.f32 1.0, %v987_v0  ;;  %1000 = verf.f32 %v637_v63 }
 0x10c   : > { %v991_v3 = vpop.eup %990  ;;  %v648_v4 = vadd.f32 1.0, %v989_v1 }
 0x10d   : > { %v993_v5 = vpop.eup %992  ;;  %v651_v8 = vadd.f32 1.0, %v991_v3  ;;  %v658_v12 = vmul.f32 %v650_v2, %v626_v6 }
 0x10e   : > { %v649_v11 = vadd.f32 1.0, %v993_v5  ;;  %v656_v14 = vmul.f32 %v648_v4, %v624_v9 }
 0x10f   : > { %v659_v13 = vmul.f32 %v651_v8, %v627_v7 }
 0x110   : > { %v657_v15 = vmul.f32 %v649_v11, %v625_v10 }
 0x111   : > { %v665_v16 = vpack.c.bf16 %v659_v13, %v658_v12 }
 0x112   : > { %v995_v17 = vpop.eup %994  ;;  %v664_v18 = vpack.c.bf16 %v657_v15, %v656_v14 }
 0x113   : > { %v997_v19 = vpop.eup %996  ;;  %v654_v20 = vadd.f32 1.0, %v995_v17 }
 0x114   : > { %v999_v21 = vpop.eup %998  ;;  %v652_v22 = vadd.f32 1.0, %v997_v19  ;;  %956 = vmatprep.mubr.msk.bf16.mxu0 %vm691_vm2, %v664_v18 }
 0x115   : > { %v1001_v23 = vpop.eup %1000  ;;  %v655_v26 = vadd.f32 1.0, %v999_v21  ;;  %957 = vmatmul.mubr.msk.bf16.vlgmr.msra.gmra.mrb[8].mxu0 %vm691_vm2, %v665_v16  ;;  %v662_v30 = vmul.f32 %v654_v20, %v630_v24 }
 0x116   : > { %v653_v29 = vadd.f32 1.0, %v1001_v23  ;;  %v660_v32 = vmul.f32 %v652_v22, %v628_v27 }
 0x117   : > { %v663_v31 = vmul.f32 %v655_v26, %v631_v25 }
 0x118   : > { %v661_v33 = vmul.f32 %v653_v29, %v629_v28 }
 0x119   : > { %v667_v34 = vpack.c.bf16 %v663_v31, %v662_v30 }
 0x11a   : > { %v666_v35 = vpack.c.bf16 %v661_v33, %v660_v32 }
 0x11c   : > { %960 = vmatprep.mubr.msk.bf16.mxu0 %vm691_vm2, %v666_v35 }
 0x11d   : > { %961 = vmatmul.mubr.msk.bf16.gmra.mrb[12].mxu0 %vm691_vm2, %v667_v34 }
 0x1e8   : > { %v958_v37 = vpop.f32.mrb[8].mxu0 }
 0x1e9   : > { %v747_v38 = vadd.f32 %v958_v37, %v878_v36  ;;  %v738_v39 = vpop.f32.mrb[9].mxu0 }
 0x1ea   : > { %v739_v40 = vadd.f32 %v878_v36, %v738_v39  ;;  %v959_v41 = vpop.f32.mrb[10].mxu0 }
 0x1eb   : > { %771 = vst.msk [vmem:[%s302_s20 + $0x10] sm:$0xff] %vm338_vm1, %v747_v38  ;;  %v750_v42 = vadd.f32 %v959_v41, %v878_v36  ;;  %v741_v43 = vpop.f32.mrb[11].mxu0 }
 0x1ec   : > { %769 = vst.msk [vmem:[%s302_s20] sm:$0xff] %vm338_vm1, %v739_v40  ;;  %v742_v44 = vadd.f32 %v878_v36, %v741_v43 }
 0x1ed   : > { %772 = vst.msk [vmem:[%s302_s20 + $0x18] sm:$0xff] %vm338_vm1, %v750_v42 }
 0x1ee   : > { %770 = vst.msk [vmem:[%s302_s20 + $0x8] sm:$0xff] %vm338_vm1, %v742_v44 }
 0x1f0   : > { %v962_v45 = vpop.f32.mrb[12].mxu0 }
 0x1f1   : > { %v763_v46 = vadd.f32 %v962_v45, %v878_v36  ;;  %v754_v47 = vpop.f32.mrb[13].mxu0 }
 0x1f2   : > { %v755_v48 = vadd.f32 %v878_v36, %v754_v47  ;;  %v963_v49 = vpop.f32.mrb[14].mxu0 }
 0x1f3   : > { %775 = vst.msk [vmem:[%s302_s20 + $0x30] sm:$0xff] %vm338_vm1, %v763_v46  ;;  %v766_v50 = vadd.f32 %v963_v49, %v878_v36  ;;  %v757_v51 = vpop.f32.mrb[15].mxu0 }
 0x1f4   : > { %773 = vst.msk [vmem:[%s302_s20 + $0x20] sm:$0xff] %vm338_vm1, %v755_v48  ;;  %v758_v52 = vadd.f32 %v878_v36, %v757_v51 }
 0x1f5   : > { %776 = vst.msk [vmem:[%s302_s20 + $0x38] sm:$0xff] %vm338_vm1, %v766_v50 }
 0x1f6   : > { %774 = vst.msk [vmem:[%s302_s20 + $0x28] sm:$0xff] %vm338_vm1, %v758_v52 }
 0x1f7 PF: > { %s17_s24 = sadd.s32 1, %s1008_s24  }
 0x1f8   : > { %p14_p4 = scmp.ge.s32.totalorder %s17_s24, 6  }
 0x1fa   :  { %16 = sbr.rel (!%p14_p4) target bundleno = 1 (0x1), region = 81 }

</bundles_post_ra>
